<compile_context>
chip_gen: v7x
topology: tpu7x:2x2x1
jax: 0.10.0
libtpu: 0.0.40
codegen_flags: <defaults>
</compile_context>

<pallas_src>
import jax
import jax.numpy as jnp
from jax.experimental import pallas as pl
from jax.experimental.pallas import tpu as pltpu


_DEFAULT_TOKEN_TILE = 256
# Per-buffer cap for the weight tile; with double-buffering this stays well
# inside v7x's 64 MiB physical VMEM (and trivially inside v5e/v6e's 128 MiB).
_WEIGHT_VMEM_BUDGET_BYTES = 16 * 1024 * 1024
_VMEM_LIMIT_BYTES = 48 * 1024 * 1024


def _round_up(x, m):
    return (x + m - 1) // m * m


def _embed_kernel(ids_ref, w_ref, o_ref, acc_ref):
    """Gather a (TILE_T, D) slab of embeddings via a one-hot matmul.

    ids_ref: (TILE_T, 1)  int32   token ids for this token tile
    w_ref:   (V_TILE, D)  weight  rows [j*V_TILE, (j+1)*V_TILE) of the table
    o_ref:   (TILE_T, D)  output slab
    acc_ref: (TILE_T, D)  f32 accumulator (carried across the vocab axis)
    """
    j = pl.program_id(1)                      # vocab-tile index (reduction axis)
    tile_t = o_ref.shape[0]
    v_tile = w_ref.shape[0]

    @pl.when(j == 0)
    def _init():
        acc_ref[...] = jnp.zeros_like(acc_ref)

    # Local row index inside this vocab tile; ids outside the tile (or out of
    # range entirely) match no column and contribute a zero row.
    ids_local = ids_ref[...] - j * v_tile                              # (T, 1)
    col = jax.lax.broadcasted_iota(jnp.int32, (tile_t, v_tile), 1)     # (T, V)
    onehot = (col == ids_local).astype(w_ref.dtype)                    # (T, V)

    # MXU gather: out[t, d] = sum_v onehot[t, v] * w[v, d]
    acc_ref[...] += jnp.dot(onehot, w_ref[...],
                            preferred_element_type=jnp.float32)

    @pl.when(j == pl.num_programs(1) - 1)
    def _finalize():
        o_ref[...] = acc_ref[...].astype(o_ref.dtype)


def embedding_forward(ids, weight, *, token_tile=_DEFAULT_TOKEN_TILE):
    """ids: int [B, S]; weight: [V, D] -> [B, S, D] = weight[ids]."""
    B, S = ids.shape
    V, D = weight.shape
    n_tok = B * S

    # --- token tiling (sublane-dense output blocks) ---
    tile_t = min(token_tile, _round_up(n_tok, 8))
    n_pad = _round_up(n_tok, tile_t)

    ids_flat = ids.reshape(-1).astype(jnp.int32)
    if n_pad != n_tok:
        ids_flat = jnp.pad(ids_flat, (0, n_pad - n_tok))  # pad ids -> row 0, sliced off below
    ids_2d = ids_flat.reshape(n_pad, 1)

    # --- vocab tiling: full table resident in VMEM when it fits the budget ---
    bytes_per_row = D * weight.dtype.itemsize
    max_rows = max(8, _WEIGHT_VMEM_BUDGET_BYTES // max(1, bytes_per_row))
    if V <= max_rows:
        v_tile = V                 # single resident block: DMA'd once, index never changes
        v_pad = V
        w_padded = weight
    else:
        v_tile = (max_rows // 128) * 128
        if v_tile == 0:
            v_tile = max(8, (max_rows // 8) * 8)
        v_pad = _round_up(V, v_tile)
        w_padded = jnp.pad(weight, ((0, v_pad - V), (0, 0)))  # zero rows: never matched

    grid = (n_pad // tile_t, v_pad // v_tile)

    out_flat = pl.pallas_call(
        _embed_kernel,
        grid=grid,
        in_specs=[
            pl.BlockSpec((tile_t, 1), lambda i, j: (i, 0)),   # token ids tile
            pl.BlockSpec((v_tile, D), lambda i, j: (j, 0)),   # weight (vocab) tile
        ],
        out_specs=pl.BlockSpec((tile_t, D), lambda i, j: (i, 0)),
        out_shape=jax.ShapeDtypeStruct((n_pad, D), weight.dtype),
        scratch_shapes=[pltpu.VMEM((tile_t, D), jnp.float32)],
        compiler_params=pltpu.CompilerParams(
            # token axis independent -> shard across v7x's 2 TensorCores;
            # vocab axis is the reduction -> arbitrary (kept innermost).
            dimension_semantics=("parallel", "arbitrary"),
            vmem_limit_bytes=_VMEM_LIMIT_BYTES,
        ),
    )(ids_2d, w_padded)

    return out_flat[:n_tok].reshape(B, S, D)


def make_embedding_params(key, num_embeddings, embedding_dim, padding_idx=None):
    """Init matching the torch module: randn / sqrt(V), padding row zeroed."""
    w = jax.random.normal(key, (num_embeddings, embedding_dim), dtype=jnp.float32)
    w = w / jnp.sqrt(jnp.float32(num_embeddings))
    if padding_idx is not None:
        if padding_idx < 0:
            padding_idx = num_embeddings + padding_idx
        w = w.at[padding_idx].set(0.0)
    return w, padding_idx


if __name__ == "__main__":
    key = jax.random.PRNGKey(0)
    k_w, k_x = jax.random.split(key)

    num_embeddings = 32
    embedding_dim = 128
    padding_idx = 0
    B, S = 2, 8

    weight, padding_idx = make_embedding_params(
        k_w, num_embeddings, embedding_dim, padding_idx=padding_idx
    )
    ids = jax.random.randint(k_x, (B, S), 0, num_embeddings, dtype=jnp.int32)

    out = embedding_forward(ids, weight)
    out = jax.block_until_ready(out)

    # Reference check (plain JAX gather).
    ref = jnp.take(weight, ids, axis=0)
    assert out.shape == (B, S, embedding_dim)
    assert out.dtype == weight.dtype
    assert jnp.allclose(out, ref, atol=1e-6), "Pallas embedding mismatch vs reference gather"

    print("KERNEL_OK")
</pallas_src>

<mosaic_0001>
module attributes {stable_mosaic.version = 11 : i64} {
  func.func @_embed_kernel(%arg0: i32, %arg1: i32, %arg2: memref<16x1xi32, #tpu.memory_space<vmem>>, %arg3: memref<32x128xf32, #tpu.memory_space<vmem>>, %arg4: memref<16x128xf32, #tpu.memory_space<vmem>>, %arg5: memref<16x128xf32, #tpu.memory_space<vmem>>) attributes {dimension_semantics = [#tpu.dimension_semantics<parallel>, #tpu.dimension_semantics<arbitrary>], iteration_bounds = array<i64: 1, 1>, scalar_prefetch = 0 : i64, scratch_operands = 1 : i64, tpu.core_type = #tpu.core_type<tc>, window_params = [{transform_indices = @transform_0, window_bounds = array<i64: 16, 1>}, {transform_indices = @transform_1, window_bounds = array<i64: 32, 128>}, {transform_indices = @transform_2, window_bounds = array<i64: 16, 128>}]} {
    %c0_i32 = arith.constant 0 : i32
    %0 = arith.cmpi eq, %arg1, %c0_i32 : i32
    %1 = arith.extui %0 : i1 to i32
    %c0_i32_0 = arith.constant 0 : i32
    %2 = arith.cmpi ne, %1, %c0_i32_0 : i32
    scf.if %2 {
      %cst_10 = arith.constant 0.000000e+00 : f32
      %20 = vector.broadcast %cst_10 : f32 to vector<16x128xf32>
      %c0_11 = arith.constant 0 : index
      %c0_12 = arith.constant 0 : index
      %21 = vector.load %arg5[%c0_11, %c0_12] : memref<16x128xf32, #tpu.memory_space<vmem>>, vector<16x128xf32>
      tpu.vector_store %arg5[%c0_11, %c0_12], %20 {strides = array<i32>} : memref<16x128xf32, #tpu.memory_space<vmem>>, vector<16x128xf32>,
    } else {
    }
    %c0 = arith.constant 0 : index
    %c0_1 = arith.constant 0 : index
    %3 = vector.load %arg2[%c0, %c0_1] : memref<16x1xi32, #tpu.memory_space<vmem>>, vector<16x1xi32>
    %c32_i32 = arith.constant 32 : i32
    %4 = arith.muli %arg1, %c32_i32 : i32
    %5 = vector.broadcast %4 : i32 to vector<16x1xi32>
    %6 = arith.subi %3, %5 : vector<16x1xi32>
    %7 = tpu.iota {dimensions = array<i32: 1>} : vector<16x32xi32>
    %8 = vector.broadcast %6 : vector<16x1xi32> to vector<16x32xi32>
    %9 = arith.cmpi eq, %7, %8 : vector<16x32xi32>
    %10 = arith.extui %9 : vector<16x32xi1> to vector<16x32xi32>
    %11 = arith.sitofp %10 : vector<16x32xi32> to vector<16x32xf32>
    %c0_2 = arith.constant 0 : index
    %c0_3 = arith.constant 0 : index
    %12 = vector.load %arg5[%c0_2, %c0_3] : memref<16x128xf32, #tpu.memory_space<vmem>>, vector<16x128xf32>
    %c0_4 = arith.constant 0 : index
    %c0_5 = arith.constant 0 : index
    %13 = vector.load %arg3[%c0_4, %c0_5] : memref<32x128xf32, #tpu.memory_space<vmem>>, vector<32x128xf32>
    %cst = arith.constant dense<0.000000e+00> : vector<16x128xf32>
    %14 = tpu.matmul %11, %13, %cst {dimension_numbers = #tpu.dot_dimension_numbers<[1], [0], [0], [1], [0, 0, 1, 1], [], []>} : vector<16x32xf32>, vector<32x128xf32>, vector<16x128xf32> -> vector<16x128xf32>
    %15 = arith.addf %12, %14 : vector<16x128xf32>
    %c0_6 = arith.constant 0 : index
    %c0_7 = arith.constant 0 : index
    %16 = vector.load %arg5[%c0_6, %c0_7] : memref<16x128xf32, #tpu.memory_space<vmem>>, vector<16x128xf32>
    tpu.vector_store %arg5[%c0_6, %c0_7], %15 {strides = array<i32>} : memref<16x128xf32, #tpu.memory_space<vmem>>, vector<16x128xf32>,
    %c0_i32_8 = arith.constant 0 : i32
    %17 = arith.cmpi eq, %arg1, %c0_i32_8 : i32
    %18 = arith.extui %17 : i1 to i32
    %c0_i32_9 = arith.constant 0 : i32
    %19 = arith.cmpi ne, %18, %c0_i32_9 : i32
    scf.if %19 {
      %c0_10 = arith.constant 0 : index
      %c0_11 = arith.constant 0 : index
      %20 = vector.load %arg5[%c0_10, %c0_11] : memref<16x128xf32, #tpu.memory_space<vmem>>, vector<16x128xf32>
      %c0_12 = arith.constant 0 : index
      %c0_13 = arith.constant 0 : index
      %21 = vector.load %arg4[%c0_12, %c0_13] : memref<16x128xf32, #tpu.memory_space<vmem>>, vector<16x128xf32>
      tpu.vector_store %arg4[%c0_12, %c0_13], %20 {strides = array<i32>} : memref<16x128xf32, #tpu.memory_space<vmem>>, vector<16x128xf32>,
    } else {
    }
    return
  }
  func.func @transform_0(%arg0: i32, %arg1: i32) -> (i32, i32) {
    %c0_i32 = arith.constant 0 : i32
    %c0_i32_0 = arith.constant 0 : i32
    return %arg0, %c0_i32 : i32, i32
  }
  func.func @transform_1(%arg0: i32, %arg1: i32) -> (i32, i32) {
    %c0_i32 = arith.constant 0 : i32
    %c0_i32_0 = arith.constant 0 : i32
    return %arg1, %c0_i32 : i32, i32
  }
  func.func @transform_2(%arg0: i32, %arg1: i32) -> (i32, i32) {
    %c0_i32 = arith.constant 0 : i32
    %c0_i32_0 = arith.constant 0 : i32
    return %arg0, %c0_i32 : i32, i32
  }
}

</mosaic_0001>

<bundles_post_ra>
// kernel: tpu_custom_call.1
= control target key start
LH: loop header
LB: loop body
LE: loop exit
PB: predicated region body
PF: predicated region fallthrough
CT: control target
= control target key end

     0   :  { %7 = vsyncpa [#allocation4], 0  ;;  %s309_s0 = inlined_call_operand.vmem [shape: s32[16,1], index: 0, kind: input, shape index: {}]   ;;  %s310_s1 = inlined_call_operand.hbm [shape: f32[32,128], index: 1, kind: input, shape index: {}]   ;;  %s311_s2 = inlined_call_operand.hbm [shape: f32[16,128], index: 2, kind: output, shape index: {}]  }
   0x1   :  { %8 = vsyncpa [#allocation5], 0  ;;  %s252_s9 = smov [#allocation3]   ;;  %s204_s13 = scalar_lea.hbm %s310_s1, 512 }
   0x2   :  { %s16_s10 = sshll.u32 %s252_s9, 4  ;;  %p205_p0 = scmp.ne.s32.totalorder %s310_s1, %s204_s13  ;;  %s17_s10 = int_to_ptr.vmem [resolvable:$true] %s16_s10 }
   0x3   :  { %p208_p1 = scmp.lt.u32.totalorder %s204_s13, %s310_s1 }
   0x5   :  { %p210_p2 = pnand %p208_p1, %p205_p0 }
   0x7   :  { %213 = shalt.err (!%p210_p2)
}
   0x8   :  { %s214_s18 = scalar_lea.vmem %s17_s10, 512  ;;  %p219_p4 = scmp.lt.s32.totalorder %s17_s10, %s17_s10 }
   0x9   :  { %p215_p3 = scmp.ne.s32.totalorder %s17_s10, %s214_s18  ;;  %p220_p5 = scmp.lt.s32.totalorder %s214_s18, %s214_s18 }
   0xb   :  { %p221_p6 = por %p220_p5, %p219_p4 }
   0xd   :  { %p222_p7 = pnand %p221_p6, %p215_p3 }
   0xf   :  { %225 = shalt.err (!%p222_p7)
}
  0x10   :  { %s253_s19 = smov 128   ;;  %s254_s20 = smov 8  }
  0x11   :  { %22 = dma.hbm_to_vmem [thread:$0]  %s310_s1, 512, %s17_s10, [#allocation4], %s253_s19, %s253_s19, %s254_s20  }
  0x12   :  { %248 = dma.done.wait [#allocation4], 512  }
  0x13   :  { %249 = vsyncadd [#allocation4], 4294966784  ;;  %v255_v0 = vmov 0   ;;  %v32_v1 = vld [vmem:[%s309_s0] sm:$0xff]  ;;  %v55_v3 = vld [vmem:[#allocation3 + $0x8] sm:$0xff]  ;;  %v38_v9 = vlaneseq  ;;  %vm58_vm0 = vcmask 261120  }
  0x14   :  { %203 = vset.pattern.permute.xlu0 %v255_v0  ;;  %v54_v2 = vld [vmem:[#allocation3] sm:$0xff]  ;;  %v56_v4 = vld [vmem:[#allocation3 + $0x10] sm:$0xff]  ;;  %v57_v5 = vld [vmem:[#allocation3 + $0x18] sm:$0xff]  ;;  %v256_v12 = vmov 0.0  }
  0x15   :  { %41 = vperm.xlu0 %203, %v32_v1   ;;  %v33_v6 = vld [vmem:[%s309_s0 + $0x8] sm:$0xff]  ;;  %v189_v7 = vpack.c.bf16 %v55_v3, %v54_v2  ;;  %v193_v8 = vpack.c.bf16 %v57_v5, %v56_v4  ;;  %v39_v10 = vand.u32 127, %v38_v9  ;;  %s257_s0 = smov [#allocation6]  }
  0x16   :  { %s156_s1 = sshll.u32 %s257_s0, 4  ;;  %s157_s1 = int_to_ptr.vmem [resolvable:$true] %s156_s1 }
  0x17   :  { %190 = vmatprep.subr.bf16.mxu0 %v189_v7  ;;  %s226_s27 = scalar_lea.vmem %s157_s1, 256  ;;  %p231_p9 = scmp.lt.s32.totalorder %s157_s1, %s157_s1 }
  0x18   :  { %192 = vmatpush3.bf16.msra.mxu0 %v189_v7  ;;  %p227_p8 = scmp.ne.s32.totalorder %s157_s1, %s226_s27  ;;  %p232_p10 = scmp.lt.s32.totalorder %s226_s27, %s226_s27 }
  0x19   :  { %44 = vperm.xlu0 %203, %v33_v6   ;;  %194 = vmatprep.subr.bf16.mxu0 %v193_v8 }
  0x1a   :  { %p233_p11 = por %p232_p10, %p231_p9 }
  0x1c   :  { %196 = vmatpush3.bf16.msra.mxu0 %v193_v8  ;;  %p234_p12 = pnand %p233_p11, %p227_p8 }
  0x94   :  { %v42_v11 = vpop.permute.xlu0 %41 }
  0x95   :  { %vm46_vm1 = vcmp.eq.s32.totalorder %v39_v10, %v42_v11 }
  0x96   :  { %v168_v13 = vsel %vm46_vm1, 1.0, %v256_v12 }
  0x97   :  { %186 = vmatprep.mubr.msk.f32.mxu0 %vm58_vm0, %v168_v13 }
  0x98   :  { %v45_v14 = vpop.permute.xlu0 %44 }
  0x99   :  { %vm47_vm2 = vcmp.eq.s32.totalorder %v39_v10, %v45_v14 }
  0x9a   :  { %v169_v15 = vsel %vm47_vm2, 1.0, %v256_v12 }
  0x9b   :  { %187 = vmatmul.mubr.msk.f32.vlgmr.msra.gmra.mrb[0].mxu0 %vm58_vm0, %v169_v15 }
 0x16e   :  { %v188_v16 = vpop.f32.mrb[0].mxu0 }
 0x16f   :  { %150 = vst [vmem:[#allocation6 + $0x8] sm:$0xff] %v188_v16  ;;  %v131_v17 = vpop.f32.mrb[1].mxu0 }
 0x170   :  { %149 = vst [vmem:[#allocation6] sm:$0xff] %v131_v17 }
 0x171   :  { %237 = shalt.err (!%p234_p12)
}
 0x172   :  { %s238_s30 = scalar_lea.hbm %s311_s2, 256 }
 0x173   :  { %p239_p13 = scmp.ne.s32.totalorder %s311_s2, %s238_s30  ;;  %p242_p0 = scmp.lt.u32.totalorder %s238_s30, %s311_s2 }
 0x175   :  { %p244_p1 = pnand %p242_p0, %p239_p13 }
 0x177   :  { %247 = shalt.err (!%p244_p1)
}
 0x178   :  { %162 = dma.vmem_to_hbm [thread:$0]  %s157_s1, 256, %s311_s2, [#allocation5], %s253_s19, %s253_s19, %s254_s20  }
 0x179   :  { %250 = dma.done.wait [#allocation5], 256  }
 0x17a   :  { %251 = vsyncadd [#allocation5], 4294967040 }
 0x17b   :  { %166 = vsyncpa [#allocation4], 1 }
 0x17c   :  { %167 = vsyncpa [#allocation5], 1 }

</bundles_post_ra>
